<compile_context>
chip_gen: v6e
topology: v6e:2x2x1
jax: 0.10.0
libtpu: 0.0.40
codegen_flags: <defaults>
</compile_context>

<pallas_src>
import math

import jax
import jax.numpy as jnp
from jax.experimental import pallas as pl
from jax.experimental.pallas import tpu as pltpu


def _cdiv(a, b):
    return -(-a // b)


def _round_up(x, m):
    return ((x + m - 1) // m) * m


# ---------------------------------------------------------------------------
# Kernel bodies.  kt = number of hidden-dim chunks (static); use_acc = keep a
# separate f32 scratch accumulator (only needed for narrow out dtypes, kt > 1).
# ---------------------------------------------------------------------------
def _make_kernel(kt, use_acc):
    def _contrib(x_ref, w1_ref, b1_ref, w2_ref):
        x = x_ref[...].astype(w1_ref.dtype)            # in-kernel cast (VPU, free)
        h = jnp.dot(x, w1_ref[...], preferred_element_type=jnp.float32)
        h = jnp.maximum(h + b1_ref[...], 0.0)
        return jnp.dot(h.astype(w2_ref.dtype), w2_ref[...],
                       preferred_element_type=jnp.float32)

    if not use_acc:
        # f32 output (or single hidden chunk): accumulate directly into o_ref.
        def kernel(x_ref, w1_ref, b1_ref, w2_ref, b2_ref, o_ref):
            contrib = _contrib(x_ref, w1_ref, b1_ref, w2_ref)
            if kt == 1:
                o_ref[...] = (contrib + b2_ref[...]).astype(o_ref.dtype)
            else:
                k = pl.program_id(1)

                @pl.when(k == 0)
                def _():
                    o_ref[...] = contrib.astype(o_ref.dtype)

                @pl.when(jnp.logical_and(k > 0, k < kt - 1))
                def _():
                    o_ref[...] += contrib.astype(o_ref.dtype)

                @pl.when(k == kt - 1)
                def _():
                    o_ref[...] = (o_ref[...] + contrib + b2_ref[...]).astype(o_ref.dtype)

        return kernel

    # Narrow output dtype with a multi-chunk hidden reduction: f32 scratch acc,
    # last chunk fused into the single output write.
    def kernel(x_ref, w1_ref, b1_ref, w2_ref, b2_ref, o_ref, acc_ref):
        contrib = _contrib(x_ref, w1_ref, b1_ref, w2_ref)
        k = pl.program_id(1)

        @pl.when(k == 0)
        def _():
            acc_ref[...] = contrib

        @pl.when(jnp.logical_and(k > 0, k < kt - 1))
        def _():
            acc_ref[...] += contrib

        @pl.when(k == kt - 1)
        def _():
            o_ref[...] = (acc_ref[...] + contrib + b2_ref[...]).astype(o_ref.dtype)

    return kernel


# ---------------------------------------------------------------------------
# Tile sizing from a per-generation VMEM budget.
# ---------------------------------------------------------------------------
def _footprint(tm, th, d_in_p, h_p, d_out_p, x_bytes, out_bytes, out_is_f32):
    kt = h_p // th
    use_acc = (not out_is_f32) and kt > 1
    fp = 2 * tm * d_in_p * x_bytes               # x tiles (double-buffered)
    fp += 2 * (d_in_p * th * 2 + th * 4)         # w1 (bf16) + b1 (f32) tiles
    fp += 2 * (th * d_out_p * 2 + d_out_p * 4)   # w2 (bf16) + b2 (f32) tiles
    fp += 2 * tm * d_out_p * out_bytes           # out tiles (double-buffered)
    if use_acc:
        fp += tm * d_out_p * 4                   # f32 scratch accumulator
    return fp


def _choose_tiles(m, d_in_p, h_p, d_out_p, x_bytes, out_bytes, out_is_f32, budget):
    # Hidden-dim tile candidates: full hidden dim first (weights stay VMEM
    # resident for the whole call), then multiples of 256 (MXU-friendly on
    # v6e/v7x), then multiples of 128 as a last resort.
    th_cands = [h_p]
    for c in range((h_p // 256) * 256, 0, -256):
        if c != h_p and h_p % c == 0:
            th_cands.append(c)
    for c in range((h_p // 128) * 128, 0, -128):
        if c != h_p and c % 256 != 0 and h_p % c == 0:
            th_cands.append(c)

    # Row-tile candidates: near-even splits of m (bounds padding waste), rounded
    # up to 16 (bf16 sublane packing), largest first (minimizes weight
    # re-streaming across row tiles).
    m16 = _round_up(max(m, 1), 16)
    tm_cands = []
    for target in (1024, 512, 256, 128, 64, 32, 16):
        n = max(_cdiv(max(m, 1), target), 1)
        tm = min(_round_up(_cdiv(max(m, 1), n), 16), m16)
        if tm not in tm_cands:
            tm_cands.append(tm)
    tm_cands.sort(reverse=True)

    best = None
    for tm in tm_cands:                 # prioritize large tm (weight traffic)
        for th in th_cands:             # then the largest MXU-friendly th
            if _footprint(tm, th, d_in_p, h_p, d_out_p,
                          x_bytes, out_bytes, out_is_f32) <= budget:
                if th >= min(512, h_p):
                    return tm, th
                if best is None:
                    best = (tm, th)
                break
    if best is not None:
        return best
    return tm_cands[-1], th_cands[-1]   # smallest tiles; let vmem_limit cover it


# ---------------------------------------------------------------------------
# One-time parameter preparation (do at load time, not per call).
# ---------------------------------------------------------------------------
def prepare_ffn_params(w1, b1, w2, b2, compute_dtype=jnp.bfloat16):
    """PyTorch layout (w1: (H, D_in), w2: (D_out, H)) -> transposed matmul
    layout, zero-padded to multiples of 128 on every feature dim, cast to the
    MXU compute dtype.  Biases stay f32."""
    hidden, d_in = w1.shape
    d_out = w2.shape[0]
    d_in_p = _round_up(d_in, 128)
    h_p = _round_up(hidden, 128)
    d_out_p = _round_up(d_out, 128)

    w1_t = jnp.zeros((d_in_p, h_p), compute_dtype).at[:d_in, :hidden].set(
        jnp.transpose(w1).astype(compute_dtype))
    w2_t = jnp.zeros((h_p, d_out_p), compute_dtype).at[:hidden, :d_out].set(
        jnp.transpose(w2).astype(compute_dtype))
    b1_p = jnp.zeros((1, h_p), jnp.float32).at[0, :hidden].set(b1.astype(jnp.float32))
    b2_p = jnp.zeros((1, d_out_p), jnp.float32).at[0, :d_out].set(b2.astype(jnp.float32))
    return dict(w1=w1_t, b1=b1_p, w2=w2_t, b2=b2_p,
                d_in=d_in, hidden=hidden, d_out=d_out)


# ---------------------------------------------------------------------------
# Forward pass.
# ---------------------------------------------------------------------------
def feedforward(x, params):
    """x: (..., D_in); params from prepare_ffn_params.  Returns (..., D_out)."""
    d_in, d_out = params["d_in"], params["d_out"]
    w1, b1, w2, b2 = params["w1"], params["b1"], params["w2"], params["b2"]
    d_in_p, h_p = w1.shape
    d_out_p = w2.shape[1]
    out_dtype = x.dtype
    out_is_f32 = out_dtype == jnp.float32

    orig_shape = x.shape
    m = math.prod(orig_shape[:-1])
    x2d = x.reshape(m, d_in)

    # Per-generation VMEM budget (~75% of physical: ~96 MiB v5e/v6e, ~48 MiB v7x).
    try:
        vmem_cap = int(pltpu.get_tpu_info().vmem_capacity_bytes)
    except Exception:
        vmem_cap = 64 << 20   # conservative fallback
    budget = int(vmem_cap * 0.75)

    x_bytes = x.dtype.itemsize
    out_bytes = jnp.dtype(out_dtype).itemsize

    tm, th = _choose_tiles(m, d_in_p, h_p, d_out_p,
                           x_bytes, out_bytes, out_is_f32, budget)
    kt = h_p // th

    # If the weights are fully VMEM-resident (single hidden chunk) and all rows
    # fit one tile, split rows into 2 tiles so the "parallel" axis can shard
    # across TensorCores (v7x megacore) -- only when padding waste stays small.
    if kt == 1 and m >= 32 and _cdiv(m, tm) == 1:
        tm2 = _round_up(_cdiv(m, 2), 16)
        if (2 * tm2 - m) * 8 <= m:
            tm = tm2

    m_p = _round_up(max(m, 1), tm)
    grid = (m_p // tm, kt)
    use_acc = (not out_is_f32) and kt > 1

    # x stays in its original dtype (cast per tile in the kernel); pad only when
    # the shapes actually require it.
    x_p = x2d
    if (m_p, d_in_p) != (m, d_in):
        x_p = jnp.pad(x_p, ((0, m_p - m), (0, d_in_p - d_in)))

    fp = _footprint(tm, th, d_in_p, h_p, d_out_p, x_bytes, out_bytes, out_is_f32)
    vmem_limit = int(min(int(vmem_cap * 0.9), max(fp + (4 << 20), 32 << 20)))

    kernel = _make_kernel(kt, use_acc)
    scratch_shapes = [pltpu.VMEM((tm, d_out_p), jnp.float32)] if use_acc else []

    out_p = pl.pallas_call(
        kernel,
        out_shape=jax.ShapeDtypeStruct((m_p, d_out_p), out_dtype),
        grid_spec=pltpu.PrefetchScalarGridSpec(
            num_scalar_prefetch=0,
            grid=grid,
            in_specs=[
                pl.BlockSpec((tm, d_in_p), lambda i, k: (i, 0)),
                pl.BlockSpec((d_in_p, th), lambda i, k: (0, k)),
                pl.BlockSpec((1, th), lambda i, k: (0, k)),
                pl.BlockSpec((th, d_out_p), lambda i, k: (k, 0)),
                pl.BlockSpec((1, d_out_p), lambda i, k: (0, 0)),
            ],
            out_specs=pl.BlockSpec((tm, d_out_p), lambda i, k: (i, 0)),
            scratch_shapes=scratch_shapes,
        ),
        compiler_params=pltpu.CompilerParams(
            dimension_semantics=("parallel", "arbitrary"),
            vmem_limit_bytes=vmem_limit,
        ),
    )(x_p, w1, b1, w2, b2)

    out2d = out_p[:m, :d_out]
    return out2d.reshape(orig_shape[:-1] + (d_out,))


if __name__ == "__main__":
    # Small shapes consistent with a transformer FFN: (batch, seq, input_dim).
    batch, seq = 2, 8
    input_dim, hidden_dim, output_dim = 32, 64, 32

    key = jax.random.PRNGKey(0)
    kx, kw1, kb1, kw2, kb2 = jax.random.split(key, 5)

    x = jax.random.normal(kx, (batch, seq, input_dim), dtype=jnp.float32)

    # Deterministic parameter init (PyTorch Linear-style uniform bounds).
    bound1 = 1.0 / jnp.sqrt(input_dim)
    w1 = jax.random.uniform(kw1, (hidden_dim, input_dim), jnp.float32, -bound1, bound1)
    b1 = jax.random.uniform(kb1, (hidden_dim,), jnp.float32, -bound1, bound1)
    bound2 = 1.0 / jnp.sqrt(hidden_dim)
    w2 = jax.random.uniform(kw2, (output_dim, hidden_dim), jnp.float32, -bound2, bound2)
    b2 = jax.random.uniform(kb2, (output_dim,), jnp.float32, -bound2, bound2)

    # One-time parameter prep (transpose + pad + bf16 cast) outside the hot path.
    params = prepare_ffn_params(w1, b1, w2, b2, compute_dtype=jnp.bfloat16)

    out = feedforward(x, params)
    out = jax.block_until_ready(out)

    # Pure-JAX f32 reference (same math as the PyTorch module).
    ref = jnp.maximum(x @ w1.T + b1, 0.0) @ w2.T + b2
    assert out.shape == (batch, seq, output_dim)
    # bf16 MXU operands with f32 accumulation -> looser tolerance vs f32 ref.
    max_err = float(jnp.max(jnp.abs(out - ref)))
    assert jnp.allclose(out, ref, atol=2e-2, rtol=2e-2), f"max abs err {max_err}"

    print("KERNEL_OK")
</pallas_src>

<mosaic_0001>
module attributes {stable_mosaic.version = 11 : i64} {
  func.func @kernel(%arg0: i32, %arg1: i32, %arg2: memref<16x128xf32, #tpu.memory_space<vmem>>, %arg3: memref<128x128xbf16, #tpu.memory_space<vmem>>, %arg4: memref<1x128xf32, #tpu.memory_space<vmem>>, %arg5: memref<128x128xbf16, #tpu.memory_space<vmem>>, %arg6: memref<1x128xf32, #tpu.memory_space<vmem>>, %arg7: memref<16x128xf32, #tpu.memory_space<vmem>>) attributes {dimension_semantics = [#tpu.dimension_semantics<parallel>, #tpu.dimension_semantics<arbitrary>], iteration_bounds = array<i64: 1, 1>, scalar_prefetch = 0 : i64, scratch_operands = 0 : i64, tpu.core_type = #tpu.core_type<tc>, window_params = [{transform_indices = @transform_0, window_bounds = array<i64: 16, 128>}, {transform_indices = @transform_1, window_bounds = array<i64: 128, 128>}, {transform_indices = @transform_2, window_bounds = array<i64: 1, 128>}, {transform_indices = @transform_3, window_bounds = array<i64: 128, 128>}, {pipeline_mode = #tpu.pipeline_mode<synchronous>, transform_indices = @transform_4, window_bounds = array<i64: 1, 128>}, {transform_indices = @transform_5, window_bounds = array<i64: 16, 128>}]} {
    %c0 = arith.constant 0 : index
    %c0_0 = arith.constant 0 : index
    %0 = vector.load %arg2[%c0, %c0_0] : memref<16x128xf32, #tpu.memory_space<vmem>>, vector<16x128xf32>
    %1 = arith.truncf %0 : vector<16x128xf32> to vector<16x128xbf16>
    %c0_1 = arith.constant 0 : index
    %c0_2 = arith.constant 0 : index
    %2 = vector.load %arg3[%c0_1, %c0_2] : memref<128x128xbf16, #tpu.memory_space<vmem>>, vector<128x128xbf16>
    %cst = arith.constant dense<0.000000e+00> : vector<16x128xf32>
    %3 = tpu.matmul %1, %2, %cst {dimension_numbers = #tpu.dot_dimension_numbers<[1], [0], [0], [1], [0, 0, 1, 1], [], []>} : vector<16x128xbf16>, vector<128x128xbf16>, vector<16x128xf32> -> vector<16x128xf32>
    %c0_3 = arith.constant 0 : index
    %c0_4 = arith.constant 0 : index
    %4 = vector.load %arg4[%c0_3, %c0_4] : memref<1x128xf32, #tpu.memory_space<vmem>>, vector<1x128xf32>
    %5 = vector.broadcast %4 : vector<1x128xf32> to vector<16x128xf32>
    %6 = arith.addf %3, %5 : vector<16x128xf32>
    %cst_5 = arith.constant 0.000000e+00 : f32
    %7 = vector.broadcast %cst_5 : f32 to vector<16x128xf32>
    %8 = arith.maximumf %6, %7 : vector<16x128xf32>
    %9 = arith.truncf %8 : vector<16x128xf32> to vector<16x128xbf16>
    %c0_6 = arith.constant 0 : index
    %c0_7 = arith.constant 0 : index
    %10 = vector.load %arg5[%c0_6, %c0_7] : memref<128x128xbf16, #tpu.memory_space<vmem>>, vector<128x128xbf16>
    %cst_8 = arith.constant dense<0.000000e+00> : vector<16x128xf32>
    %11 = tpu.matmul %9, %10, %cst_8 {dimension_numbers = #tpu.dot_dimension_numbers<[1], [0], [0], [1], [0, 0, 1, 1], [], []>} : vector<16x128xbf16>, vector<128x128xbf16>, vector<16x128xf32> -> vector<16x128xf32>
    %c0_9 = arith.constant 0 : index
    %c0_10 = arith.constant 0 : index
    %12 = vector.load %arg6[%c0_9, %c0_10] : memref<1x128xf32, #tpu.memory_space<vmem>>, vector<1x128xf32>
    %13 = vector.broadcast %12 : vector<1x128xf32> to vector<16x128xf32>
    %14 = arith.addf %11, %13 : vector<16x128xf32>
    %c0_11 = arith.constant 0 : index
    %c0_12 = arith.constant 0 : index
    %15 = vector.load %arg7[%c0_11, %c0_12] : memref<16x128xf32, #tpu.memory_space<vmem>>, vector<16x128xf32>
    tpu.vector_store %arg7[%c0_11, %c0_12], %14 {strides = array<i32>} : memref<16x128xf32, #tpu.memory_space<vmem>>, vector<16x128xf32>,
    return
  }
  func.func @transform_0(%arg0: i32, %arg1: i32) -> (i32, i32) {
    %c0_i32 = arith.constant 0 : i32
    %c0_i32_0 = arith.constant 0 : i32
    return %arg0, %c0_i32 : i32, i32
  }
  func.func @transform_1(%arg0: i32, %arg1: i32) -> (i32, i32) {
    %c0_i32 = arith.constant 0 : i32
    %c0_i32_0 = arith.constant 0 : i32
    return %c0_i32, %arg1 : i32, i32
  }
  func.func @transform_2(%arg0: i32, %arg1: i32) -> (i32, i32) {
    %c0_i32 = arith.constant 0 : i32
    %c0_i32_0 = arith.constant 0 : i32
    return %c0_i32, %arg1 : i32, i32
  }
  func.func @transform_3(%arg0: i32, %arg1: i32) -> (i32, i32) {
    %c0_i32 = arith.constant 0 : i32
    %c0_i32_0 = arith.constant 0 : i32
    return %arg1, %c0_i32 : i32, i32
  }
  func.func @transform_4(%arg0: i32, %arg1: i32) -> (i32, i32) {
    %c0_i32 = arith.constant 0 : i32
    %c0_i32_0 = arith.constant 0 : i32
    %c0_i32_1 = arith.constant 0 : i32
    return %c0_i32, %c0_i32_0 : i32, i32
  }
  func.func @transform_5(%arg0: i32, %arg1: i32) -> (i32, i32) {
    %c0_i32 = arith.constant 0 : i32
    %c0_i32_0 = arith.constant 0 : i32
    return %arg0, %c0_i32 : i32, i32
  }
}

</mosaic_0001>

<bundles_post_ra>
// kernel: tpu_custom_call.1
= control target key start
LH: loop header
LB: loop body
LE: loop exit
PB: predicated region body
PF: predicated region fallthrough
CT: control target
= control target key end

     0   :  { %10 = vsyncpa [#allocation3], 0  ;;  %s565_s0 = inlined_call_operand.hbm [shape: f32[16,128], index: 0, kind: input, shape index: {}]   ;;  %s566_s1 = inlined_call_operand.hbm [shape: bf16[128,128], index: 1, kind: input, shape index: {}]   ;;  %s567_s2 = inlined_call_operand.vmem [shape: f32[1,128], index: 2, kind: input, shape index: {}]   ;;  %s568_s3 = inlined_call_operand.hbm [shape: bf16[128,128], index: 3, kind: input, shape index: {}]   ;;  %s569_s4 = inlined_call_operand.vmem [shape: f32[1,128], index: 4, kind: input, shape index: {}]   ;;  %s570_s5 = inlined_call_operand.hbm [shape: f32[16,128], index: 5, kind: output, shape index: {}]  }
   0x1   :  { %11 = vsyncpa [#allocation6], 0 }
   0x2   :  { %12 = vsyncpa [#allocation4], 0  ;;  %s501_s18 = smov [#allocation5]  }
   0x3   :  { %s30_s19 = sshll.u32 %s501_s18, 4  ;;  %s31_s19 = int_to_ptr.vmem [resolvable:$true] %s30_s19 }
   0x4   :  { %s423_s20 = scalar_lea.vmem %s31_s19, 1024  ;;  %p428_p1 = scmp.lt.s32.totalorder %s31_s19, %s31_s19 }
   0x5   :  { %p424_p0 = scmp.ne.s32.totalorder %s31_s19, %s423_s20  ;;  %p429_p2 = scmp.lt.s32.totalorder %s423_s20, %s423_s20 }
   0x7   :  { %p430_p3 = por %p429_p2, %p428_p1 }
   0x9   :  { %p431_p4 = pnand %p430_p3, %p424_p0 }
   0xb   :  { %434 = shalt.err (!%p431_p4)
}
   0xc   :  { %s502_s21 = smov 64   ;;  %s503_s22 = smov 4  }
   0xd   :  { %36 = dma.hbm_to_vmem [thread:$0]  %s566_s1, 1024, %s31_s19, [#allocation6], %s502_s21, %s502_s21, %s503_s22  }
   0xe   :  { %s504_s25 = smov [#allocation2]  }
   0xf   :  { %s18_s26 = sshll.u32 %s504_s25, 4  ;;  %s19_s26 = int_to_ptr.vmem [resolvable:$true] %s18_s26 }
  0x10   :  { %s443_s27 = scalar_lea.vmem %s19_s26, 256  ;;  %p448_p6 = scmp.lt.s32.totalorder %s19_s26, %s19_s26 }
  0x11   :  { %p444_p5 = scmp.ne.s32.totalorder %s19_s26, %s443_s27  ;;  %p449_p7 = scmp.lt.s32.totalorder %s443_s27, %s443_s27 }
  0x13   :  { %p450_p8 = por %p449_p7, %p448_p6 }
  0x15   :  { %p451_p9 = pnand %p450_p8, %p444_p5 }
  0x17   :  { %454 = shalt.err (!%p451_p9)
}
  0x18   :  { %s505_s28 = smov 128   ;;  %s506_s29 = smov 8  }
  0x19   :  { %24 = dma.hbm_to_vmem [thread:$0]  %s565_s0, 256, %s19_s26, [#allocation3], %s505_s28, %s505_s28, %s506_s29  }
  0x1a   :  { %s507_s1 = smov [#allocation7]  }
  0x1b   :  { %s44_s7 = sshll.u32 %s507_s1, 4  ;;  %s45_s7 = int_to_ptr.vmem [resolvable:$true] %s44_s7 }
  0x1c   :  { %s463_s8 = scalar_lea.vmem %s45_s7, 1024  ;;  %p468_p11 = scmp.lt.s32.totalorder %s45_s7, %s45_s7 }
  0x1d   :  { %p464_p10 = scmp.ne.s32.totalorder %s45_s7, %s463_s8  ;;  %p469_p12 = scmp.lt.s32.totalorder %s463_s8, %s463_s8 }
  0x1f   :  { %p470_p13 = por %p469_p12, %p468_p11 }
  0x21   :  { %p471_p0 = pnand %p470_p13, %p464_p10 }
  0x23   :  { %474 = shalt.err (!%p471_p0)
}
  0x24   :  { %50 = dma.hbm_to_vmem [thread:$0]  %s568_s3, 1024, %s45_s7, [#allocation6], %s502_s21, %s502_s21, %s503_s22  }
  0x25   :  { %495 = dma.done.wait [#allocation3], 256  }
  0x26   :  { %496 = vsyncadd [#allocation3], 4294967040 }
  0x27   :  { %497 = dma.done.wait [#allocation6], 2048  }
  0x28   :  { %498 = vsyncadd [#allocation6], 4294965248  ;;  %v508_v0 = vmov 0.0   ;;  %vm509_vm0 = vmmov 0   ;;  %v399_v1 = vld [vmem:[#allocation5 + $0x38] sm:$0xff]   ;;  %v400_v2 = vld [vmem:[#allocation5 + $0x30] sm:$0xff]  }
  0x29   :  { %349 = vmatprep.subr.bf16.mxu0 %v508_v0  ;;  %365 = vmatprep.mubr.msk.bf16.mxu0 %vm509_vm0, %v508_v0  ;;  %v401_v3 = vld [vmem:[#allocation5 + $0x28] sm:$0xff]   ;;  %v407_v4 = vld [vmem:[#allocation7 + $0x38] sm:$0xff]   ;;  %v402_v5 = vld [vmem:[#allocation5 + $0x20] sm:$0xff]   ;;  %s510_s13 = smov [#allocation8]  }
  0x2a   :  { %369 = vmatprep.subr.bf16.mxu1 %v508_v0  ;;  %385 = vmatprep.mubr.msk.bf16.mxu1 %vm509_vm0, %v508_v0  ;;  %v408_v6 = vld [vmem:[#allocation7 + $0x30] sm:$0xff]   ;;  %v403_v7 = vld [vmem:[#allocation5 + $0x18] sm:$0xff]   ;;  %v409_v8 = vld [vmem:[#allocation7 + $0x28] sm:$0xff]   ;;  %s300_s14 = sshll.u32 %s510_s13, 4  ;;  %s301_s14 = int_to_ptr.vmem [resolvable:$true] %s300_s14 }
  0x2b   :  { %350 = vmatpush3.bf16.msra.mxu0 %v399_v1  ;;  %370 = vmatpush3.bf16.msra.mxu1 %v407_v4  ;;  %v404_v9 = vld [vmem:[#allocation5 + $0x10] sm:$0xff]   ;;  %v410_v10 = vld [vmem:[#allocation7 + $0x20] sm:$0xff]   ;;  %v405_v11 = vld [vmem:[#allocation5 + $0x8] sm:$0xff]   ;;  %p480_p2 = scmp.lt.s32.totalorder %s301_s14, %s301_s14 }
  0x2c   :  { %351 = vmatprep.subr.bf16.mxu0 %v508_v0  ;;  %371 = vmatprep.subr.bf16.mxu1 %v508_v0  ;;  %v411_v12 = vld [vmem:[#allocation7 + $0x18] sm:$0xff]   ;;  %v406_v13 = vld [vmem:[#allocation5] sm:$0xff]   ;;  %v63_v14 = vld [vmem:[#allocation2] sm:$0xff] }
  0x2d   :  { %v64_v15 = vld [vmem:[#allocation2 + $0x8] sm:$0xff]  ;;  %v412_v17 = vld [vmem:[#allocation7 + $0x10] sm:$0xff]   ;;  %v413_v18 = vld [vmem:[#allocation7 + $0x8] sm:$0xff]  }
  0x2e   :  { %v65_v16 = vpack.c.bf16 %v64_v15, %v63_v14  ;;  %v414_v19 = vld [vmem:[#allocation7] sm:$0xff]   ;;  %v313_v20 = vld [vmem:[%s567_s2] ss:$0 sm:$0xff]  ;;  %s475_s2 = scalar_lea.vmem %s301_s14, 256 }
  0x2f   :  { %352 = vmatpush3.bf16.msra.mxu0 %v400_v2  ;;  %372 = vmatpush3.bf16.msra.mxu1 %v408_v6  ;;  %v322_v30 = vld [vmem:[%s569_s4] ss:$0 sm:$0xff]  ;;  %p476_p1 = scmp.ne.s32.totalorder %s301_s14, %s475_s2  ;;  %p481_p3 = scmp.lt.s32.totalorder %s475_s2, %s475_s2 }
  0x30   :  { %353 = vmatprep.subr.bf16.mxu0 %v508_v0  ;;  %373 = vmatprep.subr.bf16.mxu1 %v508_v0 }
  0x31   :  { %p482_p4 = por %p481_p3, %p480_p2 }
  0x33   :  { %354 = vmatpush3.bf16.msra.mxu0 %v401_v3  ;;  %374 = vmatpush3.bf16.msra.mxu1 %v409_v8  ;;  %p483_p5 = pnand %p482_p4, %p476_p1 }
  0x34   :  { %355 = vmatprep.subr.bf16.mxu0 %v508_v0  ;;  %375 = vmatprep.subr.bf16.mxu1 %v508_v0 }
  0x37   :  { %356 = vmatpush3.bf16.msra.mxu0 %v402_v5  ;;  %376 = vmatpush3.bf16.msra.mxu1 %v410_v10 }
  0x38   :  { %357 = vmatprep.subr.bf16.mxu0 %v508_v0  ;;  %377 = vmatprep.subr.bf16.mxu1 %v508_v0 }
  0x3b   :  { %358 = vmatpush3.bf16.msra.mxu0 %v403_v7  ;;  %378 = vmatpush3.bf16.msra.mxu1 %v411_v12 }
  0x3c   :  { %359 = vmatprep.subr.bf16.mxu0 %v508_v0  ;;  %379 = vmatprep.subr.bf16.mxu1 %v508_v0 }
  0x3f   :  { %360 = vmatpush3.bf16.msra.mxu0 %v404_v9  ;;  %380 = vmatpush3.bf16.msra.mxu1 %v412_v17 }
  0x40   :  { %361 = vmatprep.subr.bf16.mxu0 %v508_v0  ;;  %381 = vmatprep.subr.bf16.mxu1 %v508_v0 }
  0x43   :  { %362 = vmatpush3.bf16.msra.mxu0 %v405_v11  ;;  %382 = vmatpush3.bf16.msra.mxu1 %v413_v18 }
  0x44   :  { %363 = vmatprep.subr.bf16.mxu0 %v508_v0  ;;  %383 = vmatprep.subr.bf16.mxu1 %v508_v0 }
  0x47   :  { %364 = vmatpush3.bf16.msra.mxu0 %v406_v13  ;;  %384 = vmatpush3.bf16.msra.mxu1 %v414_v19 }
  0x4a   :  { %366 = vmatmul.mubr.bf16.vlgmr.msra.gmra.mxu0 %v65_v16 }
 0x10a   :  { %v171_v21 = vpop.f32.mrf.mxu0 }
 0x10b   :  { %v172_v23 = vadd.f32 %v313_v20, %v171_v21 }
 0x10c   :  { %v367_v22 = vpop.f32.mrf.mxu0 }
 0x10d   :  { %v178_v27 = vmax.f32 %v172_v23, 0.0 }
 0x10e   :  { %v174_v24 = vpop.f32.mrf.mxu0 }
 0x10f   :  { %v175_v25 = vadd.f32 %v313_v20, %v174_v24 }
 0x110   :  { %v368_v26 = vpop.f32.mrf.mxu0 }
 0x111   :  { %v179_v28 = vmax.f32 %v175_v25, 0.0 }
 0x113   :  { %v180_v29 = vpack.c.bf16 %v179_v28, %v178_v27 }
 0x115   :  { %386 = vmatmul.mubr.bf16.vlgmr.msra.gmra.mxu1 %v180_v29 }
 0x1d5   :  { %v286_v31 = vpop.f32.mrf.mxu1 }
 0x1d6   :  { %v287_v32 = vadd.f32 %v322_v30, %v286_v31 }
 0x1d7   :  { %v387_v33 = vpop.f32.mrf.mxu1 }
 0x1d8   :  { %293 = vst [vmem:[#allocation8] sm:$0xff] %v287_v32 }
 0x1d9   :  { %v289_v34 = vpop.f32.mrf.mxu1 }
 0x1da   :  { %v290_v35 = vadd.f32 %v322_v30, %v289_v34 }
 0x1db   :  { %v388_v36 = vpop.f32.mrf.mxu1 }
 0x1dc   :  { %294 = vst [vmem:[#allocation8 + $0x8] sm:$0xff] %v290_v35 }
 0x1dd   :  { %486 = shalt.err (!%p483_p5)
}
 0x1de   :  { %306 = dma.vmem_to_hbm [thread:$0]  %s301_s14, 256, %s570_s5, [#allocation4], %s505_s28, %s505_s28, %s506_s29  }
 0x1df   :  { %499 = dma.done.wait [#allocation4], 256  }
 0x1e0   :  { %500 = vsyncadd [#allocation4], 4294967040 }
 0x1e1   :  { %310 = vsyncpa [#allocation3], 1 }
 0x1e2   :  { %311 = vsyncpa [#allocation6], 1 }
 0x1e3   :  { %312 = vsyncpa [#allocation4], 1 }

</bundles_post_ra>
